<compile_context>
chip_gen: v6e
topology: v6e:2x2x1
jax: 0.10.0
libtpu: 0.0.40
codegen_flags: <defaults>
</compile_context>

<pallas_src>
import functools
import math

import jax
import jax.numpy as jnp
from jax import lax
from jax.experimental import pallas as pl
from jax.experimental.pallas import tpu as pltpu


def _mha_attn_kernel(qh_ref, kh_ref, vh_ref, wo_ref, o_ref, *, approx_recip):
    """One (batch, q-tile) step: head-batched attention + fused output proj.

    qh_ref: (1, H, tq, dk) bf16, already carries the 1/sqrt(dk) scale.
    kh_ref: (1, H, S,  dk) bf16 (full sequence, resident per batch).
    vh_ref: (1, H, S,  dv) bf16.
    wo_ref: (H, dv, D)     bf16 (Wo^T reshaped per head).
    o_ref : (1, tq, D)     f32 output tile.
    """
    qh = qh_ref[0]            # (H, tq, dk)
    kh = kh_ref[0]            # (H, S,  dk)
    vh = vh_ref[0]            # (H, S,  dv)

    # Scores for all heads at once (H is the MXU batch dim), f32 accumulation.
    s = lax.dot_general(qh, kh, (((2,), (2,)), ((0,), (0,))),
                        preferred_element_type=jnp.float32)      # (H, tq, S)

    # Numerically-stable softmax; normalization is deferred to after the PV
    # matmul (scale the (H, tq, dv) result instead of the (H, tq, S) exp).
    m = jnp.max(s, axis=-1, keepdims=True)
    e = jnp.exp(s - m)                                           # (H, tq, S)
    denom = jnp.sum(e, axis=-1, keepdims=True)                   # (H, tq, 1)
    if approx_recip:
        inv = pl.reciprocal(denom, approx=True)
    else:
        inv = 1.0 / denom

    pv = lax.dot_general(e.astype(jnp.bfloat16), vh,
                         (((2,), (1,)), ((0,), (0,))),
                         preferred_element_type=jnp.float32)     # (H, tq, dv)
    heads = (pv * inv).astype(jnp.bfloat16)                      # (H, tq, dv)

    # Output projection: concat(heads) @ Wo^T == sum_h heads_h @ Wo^T_h.
    o3 = lax.dot_general(heads, wo_ref[...],
                         (((2,), (1,)), ((0,), (0,))),
                         preferred_element_type=jnp.float32)     # (H, tq, D)
    o_ref[0] = jnp.sum(o3, axis=0)                               # (tq, D)


def multi_head_attention(q, k, v, wq, wk, wv, wo_weight, *, q_tile=None,
                         approx_reciprocal=True):
    """q, k, v: (B, S, D); wq/wk/wv: (H, dk|dv, D); wo_weight: (D, D).

    approx_reciprocal=True uses the EUP approximate reciprocal for the softmax
    denominator (~1e-3 relative error, within bf16 tolerance); set False for
    an exact divide.
    """
    B, S, D = q.shape
    H, dk, din = wq.shape
    dv = wv.shape[1]
    assert din == D, "projection weights must match d_model"
    # The kernel (like the PyTorch module) assumes the heads tile d_model.
    assert H * dk == D and H * dv == D, "d_model must be divisible by h"
    scaling = 1.0 / math.sqrt(dk)
    bf = jnp.bfloat16

    # Host-side projections: one batched XLA matmul each, emitted directly in
    # the per-head layout (B, H, S, dk|dv) so the kernel never slices heads
    # out of a lane-packed (.., D) tensor.  The score scale folds into Wq.
    qh = jnp.einsum('bsd,hed->bhse', q, wq * scaling).astype(bf)
    kh = jnp.einsum('bsd,hed->bhse', k, wk).astype(bf)
    vh = jnp.einsum('bsd,hed->bhse', v, wv).astype(bf)
    wo3 = wo_weight.T.reshape(H, dv, D).astype(bf)   # row h*dv+e of Wo^T

    # Query tile selection: keep the (H, tq, S) f32 score/exp temporaries and
    # the (H, tq, D) f32 output-projection intermediate under a VMEM budget.
    def _step_bytes(tq):
        return (2 * H * tq * S * 4            # score + exp (f32)
                + H * tq * D * 4              # output-projection intermediate
                + H * tq * dv * 4             # PV result (f32)
                + 2 * H * tq * dk * 2         # double-buffered q block (bf16)
                + 2 * tq * D * 4)             # double-buffered out block (f32)

    if q_tile is None:
        q_tile = S
        budget = 24 << 20
        while (q_tile > 8 and q_tile % 2 == 0
               and (q_tile > 1024 or _step_bytes(q_tile) > budget)):
            q_tile //= 2
    assert S % q_tile == 0, "sequence length must divide the query tile"
    n_qt = S // q_tile

    # VMEM plan: blocks are double-buffered by the pipeline; temporaries are
    # single-buffered.  Cap generation-aware (~75% of physical VMEM).
    est = (_step_bytes(q_tile)
           + 2 * (H * S * dk * 2 + H * S * dv * 2)   # K/V blocks (bf16, x2)
           + 2 * D * D * 2)                          # Wo block (bf16, x2)
    try:
        phys_vmem = pltpu.get_tpu_info().vmem_capacity_bytes
    except Exception:
        phys_vmem = 64 << 20                         # assume smallest (v7x)
    vmem_limit = int(min(max(2 * est, 16 << 20), int(phys_vmem * 0.75)))

    grid_spec = pltpu.PrefetchScalarGridSpec(
        num_scalar_prefetch=0,
        grid=(B, n_qt),
        in_specs=[
            pl.BlockSpec((1, H, q_tile, dk), lambda b, t: (b, 0, t, 0)),  # Q
            pl.BlockSpec((1, H, S, dk),      lambda b, t: (b, 0, 0, 0)),  # K
            pl.BlockSpec((1, H, S, dv),      lambda b, t: (b, 0, 0, 0)),  # V
            pl.BlockSpec((H, dv, D),         lambda b, t: (0, 0, 0)),     # WoT
        ],
        out_specs=pl.BlockSpec((1, q_tile, D), lambda b, t: (b, t, 0)),
    )

    kernel = functools.partial(_mha_attn_kernel, approx_recip=approx_reciprocal)
    return pl.pallas_call(
        kernel,
        out_shape=jax.ShapeDtypeStruct((B, S, D), jnp.float32),
        grid_spec=grid_spec,
        compiler_params=pltpu.CompilerParams(
            dimension_semantics=("parallel", "parallel"),
            vmem_limit_bytes=vmem_limit),
    )(qh, kh, vh, wo3)


def reference_mha(q, k, v, wq, wk, wv, wo_weight):
    """Pure-JAX f32 replica of the PyTorch forward (mask=None)."""
    H, dk, D = wq.shape
    scaling = 1.0 / math.sqrt(dk)
    heads = []
    for h in range(H):
        qh = q @ wq[h].T
        kh = k @ wk[h].T
        vh = v @ wv[h].T
        score = (qh @ jnp.swapaxes(kh, -1, -2)) * scaling
        p = jax.nn.softmax(score, axis=-1)
        heads.append(p @ vh)
    concat = jnp.concatenate(heads, axis=-1)
    return concat @ wo_weight.T


if __name__ == "__main__":
    # Small shapes consistent with the module (d_model divisible by h).
    B, S, D, H = 2, 16, 128, 4
    dk = dv = D // H

    key = jax.random.PRNGKey(0)
    kq, kk, kv, kwq, kwk, kwv, kwo = jax.random.split(key, 7)

    q = jax.random.normal(kq, (B, S, D), dtype=jnp.float32)
    k = jax.random.normal(kk, (B, S, D), dtype=jnp.float32)
    v = jax.random.normal(kv, (B, S, D), dtype=jnp.float32)

    # Deterministic synthetic parameters.  (In the PyTorch module all Wq heads
    # are deepcopies of one Linear — identical values at init; distinct values
    # are used here to make the test stronger.)
    scale = 1.0 / math.sqrt(D)
    wq = jax.random.uniform(kwq, (H, dk, D), jnp.float32, -scale, scale)
    wk = jax.random.uniform(kwk, (H, dk, D), jnp.float32, -scale, scale)
    wv = jax.random.uniform(kwv, (H, dv, D), jnp.float32, -scale, scale)
    wo = jax.random.uniform(kwo, (D, D), jnp.float32, -scale, scale)

    # q_tile=8 exercises the q-tile grid axis (grid = (B, 2)).
    out = multi_head_attention(q, k, v, wq, wk, wv, wo, q_tile=8)
    out = jax.block_until_ready(out)

    ref = reference_mha(q, k, v, wq, wk, wv, wo)
    assert out.shape == (B, S, D)
    # bf16 MXU operands with f32 accumulation: tolerance loosened vs pure f32.
    max_err = float(jnp.max(jnp.abs(out - ref)))
    assert jnp.allclose(out, ref, atol=3e-2, rtol=3e-2), max_err

    print("KERNEL_OK")
</pallas_src>

<mosaic_0001>
module attributes {stable_mosaic.version = 11 : i64} {
  func.func @_mha_attn_kernel(%arg0: i32, %arg1: i32, %arg2: memref<1x4x8x32xbf16, #tpu.memory_space<vmem>>, %arg3: memref<1x4x16x32xbf16, #tpu.memory_space<vmem>>, %arg4: memref<1x4x16x32xbf16, #tpu.memory_space<vmem>>, %arg5: memref<4x32x128xbf16, #tpu.memory_space<vmem>>, %arg6: memref<1x8x128xf32, #tpu.memory_space<vmem>>) attributes {dimension_semantics = [#tpu.dimension_semantics<parallel>, #tpu.dimension_semantics<parallel>], iteration_bounds = array<i64: 2, 2>, scalar_prefetch = 0 : i64, scratch_operands = 0 : i64, tpu.core_type = #tpu.core_type<tc>, window_params = [{transform_indices = @transform_0, window_bounds = array<i64: 1, 4, 8, 32>}, {transform_indices = @transform_1, window_bounds = array<i64: 1, 4, 16, 32>}, {transform_indices = @transform_2, window_bounds = array<i64: 1, 4, 16, 32>}, {pipeline_mode = #tpu.pipeline_mode<synchronous>, transform_indices = @transform_3, window_bounds = array<i64: 4, 32, 128>}, {transform_indices = @transform_4, window_bounds = array<i64: 1, 8, 128>}]} {
    %c0 = arith.constant 0 : index
    %c0_0 = arith.constant 0 : index
    %c0_1 = arith.constant 0 : index
    %c0_2 = arith.constant 0 : index
    %0 = vector.load %arg2[%c0, %c0_0, %c0_1, %c0_2] : memref<1x4x8x32xbf16, #tpu.memory_space<vmem>>, vector<1x4x8x32xbf16>
    %1 = vector.shape_cast %0 : vector<1x4x8x32xbf16> to vector<4x8x32xbf16>
    %c0_3 = arith.constant 0 : index
    %c0_4 = arith.constant 0 : index
    %c0_5 = arith.constant 0 : index
    %c0_6 = arith.constant 0 : index
    %2 = vector.load %arg3[%c0_3, %c0_4, %c0_5, %c0_6] : memref<1x4x16x32xbf16, #tpu.memory_space<vmem>>, vector<1x4x16x32xbf16>
    %3 = vector.shape_cast %2 : vector<1x4x16x32xbf16> to vector<4x16x32xbf16>
    %c0_7 = arith.constant 0 : index
    %c0_8 = arith.constant 0 : index
    %c0_9 = arith.constant 0 : index
    %c0_10 = arith.constant 0 : index
    %4 = vector.load %arg4[%c0_7, %c0_8, %c0_9, %c0_10] : memref<1x4x16x32xbf16, #tpu.memory_space<vmem>>, vector<1x4x16x32xbf16>
    %5 = vector.shape_cast %4 : vector<1x4x16x32xbf16> to vector<4x16x32xbf16>
    %cst = arith.constant dense<0.000000e+00> : vector<4x8x16xf32>
    %6 = tpu.matmul %1, %3, %cst {dimension_numbers = #tpu.dot_dimension_numbers<[2], [2], [1], [1], [0, 0, 0, 1, 1, 1], [0], [0]>} : vector<4x8x32xbf16>, vector<4x16x32xbf16>, vector<4x8x16xf32> -> vector<4x8x16xf32>
    %cst_11 = arith.constant dense<0xFF800000> : vector<4x8xf32>
    %7 = vector.multi_reduction <maximumf>, %6, %cst_11 [2] : vector<4x8x16xf32> to vector<4x8xf32>
    %8 = vector.shape_cast %7 : vector<4x8xf32> to vector<4x8x1xf32>
    %9 = vector.broadcast %8 : vector<4x8x1xf32> to vector<4x8x16xf32>
    %10 = arith.subf %6, %9 : vector<4x8x16xf32>
    %11 = math.exp %10 : vector<4x8x16xf32>
    %cst_12 = arith.constant dense<0.000000e+00> : vector<4x8xf32>
    %12 = vector.multi_reduction <add>, %11, %cst_12 [2] : vector<4x8x16xf32> to vector<4x8xf32>
    %13 = vector.shape_cast %12 : vector<4x8xf32> to vector<4x8x1xf32>
    %14 = tpu.reciprocal %13 {approx = true} : vector<4x8x1xf32> -> vector<4x8x1xf32>
    %15 = arith.truncf %11 : vector<4x8x16xf32> to vector<4x8x16xbf16>
    %cst_13 = arith.constant dense<0.000000e+00> : vector<4x8x32xf32>
    %16 = tpu.matmul %15, %5, %cst_13 {dimension_numbers = #tpu.dot_dimension_numbers<[2], [1], [1], [2], [0, 0, 0, 1, 1, 2], [0], [0]>} : vector<4x8x16xbf16>, vector<4x16x32xbf16>, vector<4x8x32xf32> -> vector<4x8x32xf32>
    %17 = vector.broadcast %14 : vector<4x8x1xf32> to vector<4x8x32xf32>
    %18 = arith.mulf %16, %17 : vector<4x8x32xf32>
    %19 = arith.truncf %18 : vector<4x8x32xf32> to vector<4x8x32xbf16>
    %c0_14 = arith.constant 0 : index
    %c0_15 = arith.constant 0 : index
    %c0_16 = arith.constant 0 : index
    %20 = vector.load %arg5[%c0_14, %c0_15, %c0_16] : memref<4x32x128xbf16, #tpu.memory_space<vmem>>, vector<4x32x128xbf16>
    %cst_17 = arith.constant dense<0.000000e+00> : vector<4x8x128xf32>
    %21 = tpu.matmul %19, %20, %cst_17 {dimension_numbers = #tpu.dot_dimension_numbers<[2], [1], [1], [2], [0, 0, 0, 1, 1, 2], [0], [0]>} : vector<4x8x32xbf16>, vector<4x32x128xbf16>, vector<4x8x128xf32> -> vector<4x8x128xf32>
    %cst_18 = arith.constant dense<0.000000e+00> : vector<8x128xf32>
    %22 = vector.multi_reduction <add>, %21, %cst_18 [0] : vector<4x8x128xf32> to vector<8x128xf32>
    %c0_19 = arith.constant 0 : index
    %c0_20 = arith.constant 0 : index
    %c0_21 = arith.constant 0 : index
    %23 = vector.load %arg6[%c0_19, %c0_20, %c0_21] : memref<1x8x128xf32, #tpu.memory_space<vmem>>, vector<1x8x128xf32>
    %24 = vector.shape_cast %23 : vector<1x8x128xf32> to vector<8x128xf32>
    %25 = vector.shape_cast %22 : vector<8x128xf32> to vector<1x8x128xf32>
    tpu.vector_store %arg6[%c0_19, %c0_20, %c0_21], %25 {strides = array<i32>} : memref<1x8x128xf32, #tpu.memory_space<vmem>>, vector<1x8x128xf32>,
    return
  }
  func.func @transform_0(%arg0: i32, %arg1: i32) -> (i32, i32, i32, i32) {
    %c0_i32 = arith.constant 0 : i32
    %c0_i32_0 = arith.constant 0 : i32
    %c0_i32_1 = arith.constant 0 : i32
    return %arg0, %c0_i32, %arg1, %c0_i32_0 : i32, i32, i32, i32
  }
  func.func @transform_1(%arg0: i32, %arg1: i32) -> (i32, i32, i32, i32) {
    %c0_i32 = arith.constant 0 : i32
    %c0_i32_0 = arith.constant 0 : i32
    %c0_i32_1 = arith.constant 0 : i32
    %c0_i32_2 = arith.constant 0 : i32
    return %arg0, %c0_i32, %c0_i32_0, %c0_i32_1 : i32, i32, i32, i32
  }
  func.func @transform_2(%arg0: i32, %arg1: i32) -> (i32, i32, i32, i32) {
    %c0_i32 = arith.constant 0 : i32
    %c0_i32_0 = arith.constant 0 : i32
    %c0_i32_1 = arith.constant 0 : i32
    %c0_i32_2 = arith.constant 0 : i32
    return %arg0, %c0_i32, %c0_i32_0, %c0_i32_1 : i32, i32, i32, i32
  }
  func.func @transform_3(%arg0: i32, %arg1: i32) -> (i32, i32, i32) {
    %c0_i32 = arith.constant 0 : i32
    %c0_i32_0 = arith.constant 0 : i32
    %c0_i32_1 = arith.constant 0 : i32
    %c0_i32_2 = arith.constant 0 : i32
    return %c0_i32, %c0_i32_0, %c0_i32_1 : i32, i32, i32
  }
  func.func @transform_4(%arg0: i32, %arg1: i32) -> (i32, i32, i32) {
    %c0_i32 = arith.constant 0 : i32
    %c0_i32_0 = arith.constant 0 : i32
    return %arg0, %arg1, %c0_i32 : i32, i32, i32
  }
}

</mosaic_0001>

<bundles_post_ra>
// kernel: tpu_custom_call.1
= control target key start
LH: loop header
LB: loop body
LE: loop exit
PB: predicated region body
PF: predicated region fallthrough
CT: control target
= control target key end

     0   :  { %s2204_s0 = inlined_call_operand.hbm [shape: bf16[2,4,16,32], index: 0, kind: input, shape index: {}]   ;;  %s2205_s1 = inlined_call_operand.hbm [shape: bf16[2,4,16,32], index: 1, kind: input, shape index: {}]   ;;  %s2206_s2 = inlined_call_operand.hbm [shape: bf16[2,4,16,32], index: 2, kind: input, shape index: {}]   ;;  %s2207_s3 = inlined_call_operand.hbm [shape: bf16[4,32,128], index: 3, kind: input, shape index: {}]   ;;  %s2208_s4 = inlined_call_operand.hbm [shape: f32[2,16,128], index: 4, kind: output, shape index: {}]  }
   0x1   :  { %2234 = sst [smem:[#allocation26_spill]] %s2205_s1 }
   0x2   :  { %2235 = sst [smem:[#allocation27_spill]] %s2206_s2 }
   0x3   :  { %2236 = sst [smem:[#allocation28_spill]] %s2207_s3 }
   0x4   :  { %2237 = sst [smem:[#allocation29_spill]] %s2208_s4 }
   0x5   :  { %9 = vsyncpa [#allocation3], 0 }
   0x6   :  { %11 = vsyncpa [#allocation3 + $0x1], 0 }
   0x7   :  { %12 = vsyncpa [#allocation6], 0 }
   0x8   :  { %14 = vsyncpa [#allocation6 + $0x1], 0 }
   0x9   :  { %15 = vsyncpa [#allocation9], 0 }
   0xa   :  { %16 = vsyncpa [#allocation4], 0 }
   0xb   :  { %18 = vsyncpa [#allocation4 + $0x1], 0  ;;  %s1792_s15 = smov 0   ;;  %s1794_s16 = smov 0  }
   0xc   :  { %s1796_s17 = smov 0   ;;  %s1798_s18 = smov 0  }
   0xd   :  { %s1800_s19 = smov 0   ;;  %s1802_s20 = smov 0  }
   0xe   :  { %s1804_s21 = smov 0   ;;  %s1806_s22 = smov 0  }
   0xf   :  { %s1808_s23 = smov 0   ;;  %s1810_s24 = smov 0  }
  0x10   :  { %s1812_s25 = smov 0  }
  0x11 LB: > { %2238 = sst [smem:[#allocation15_spill]] %s1719_s16  ;;  %p2215_p0 = scmp.eq.s32.totalorder %s1755_s25, 0  ;;  %s1755_s25 = sphi %s1812_s25, %s24_s25   ;;  %s1751_s24 = sphi %s1810_s24, %s2298_s24   ;;  %s1747_s23 = sphi %s1808_s23, %s2297_s23   ;;  %s1743_s22 = sphi %s1806_s22, %s2296_s22   ;;  %s1739_s21 = sphi %s1804_s21, %s2295_s21   ;;  %s1735_s20 = sphi %s1802_s20, %s2294_s20   ;;  %s1731_s19 = sphi %s1800_s19, %s2293_s19   ;;  %s1727_s18 = sphi %s1798_s18, %s2289_s18   ;;  %s1723_s17 = sphi %s1796_s17, %s2292_s17   ;;  %s1719_s16 = sphi %s1794_s16, %s2291_s16   ;;  %s1715_s15 = sphi %s1792_s15, %s2288_s15  }
  0x12   : > { %2239 = sst [smem:[#allocation16_spill]] %s1727_s18  ;;  %p78_p1 = scmp.ne.s32.totalorder %s1723_s17, %s1719_s16 }
  0x13   : > { %2240 = sst [smem:[#allocation17_spill]] %s1731_s19  ;;  %p2210_p3 = scmp.lt.s32.totalorder %s1755_s25, 4 }
  0x14   : > { %2241 = sst [smem:[#allocation18_spill]] %s1739_s21  ;;  %p80_p2 = por %p78_p1, %p2215_p0 }
  0x15   : > { %2242 = sst [smem:[#allocation19_spill]] %s1743_s22  ;;  %s218_s28 = sand.u32 1, %s1755_s25  }
  0x16   : > { %s220_s29 = sand.u32 1, %s1723_s17   ;;  %s1247_s5 = sshll.u32 %s1751_s24, 9 }
  0x17   : > { %s1857_s30 = sshll.u32 %s220_s29, 5  ;;  %s2243_s1 = sld [smem:[#allocation26_spill]] }
  0x18   : > { %s222_s9 = scalar_lea.vmem [#allocation5], %s1857_s30  ;;  %p1866_p4 = pnand %p2210_p3, %p80_p2 }
  0x19   : > { %s229_s10 = sshll.u32 %s222_s9, 4  ;;  %s2245_s2 = sld [smem:[#allocation27_spill]]  ;;  %s230_s10 = int_to_ptr.vmem [resolvable:$true] %s229_s10 }
  0x1a   : > { %s1875_s29 = scalar_lea.sflag [#allocation6], %s218_s28  ;;  %p2209_p5 = pneg %p1866_p4 }
  0x1b   : > { %s1530_s6 = scalar_lea.vmem %s230_s10, 512  ;;  %s1757_s7 = smov [#allocation5]  }
  0x1c   : > { %p1531_p6 = scmp.ne.s32.totalorder %s230_s10, %s1530_s6  ;;  %s1535_s9 = sshll.u32 %s1757_s7, 4  ;;  %s1536_s9 = int_to_ptr.vmem [resolvable:$false] %s1535_s9 }
  0x1d   : > { %s228_s8 = scalar_lea.hbm %s2243_s1, %s1247_s5  ;;  %s1537_s27 = scalar_lea.vmem %s1536_s9, 1024 }
  0x1e   : > { %p1533_p7 = pnand %p1531_p6, %p2209_p5  ;;  %p1538_p9 = scmp.lt.s32.totalorder %s230_s10, %s1536_s9 }
  0x1f   : > { %s1873_s14 = scalar_lea.hbm %s2245_s2, %s1247_s5  ;;  %p1539_p10 = scmp.lt.s32.totalorder %s1537_s27, %s1530_s6 }
  0x20   : > { %p1534_p8 = pneg %p1533_p7 }
  0x21   : > { %p1540_p11 = por %p1539_p10, %p1538_p9 }
  0x23   : > { %p1541_p12 = pnand %p1540_p11, %p1534_p8 }
  0x25   : > { %1544 = shalt.err (!%p1541_p12)
}
  0x26   : > { %s2211_s5 = smov 64   ;;  %s2213_s28 = smov 4  }
  0x27   : > { %1379 = dma.hbm_to_vmem [thread:$0]  (!%p1866_p4), %s228_s8, 512, %s230_s10, %s1875_s29, %s2211_s5, %s2211_s5, %s2213_s28  }
  0x28   : > { %s243_s27 = scalar_lea.vmem [#allocation7], %s1857_s30  ;;  %s1892_s13 = sadd.s32 4294967295, %s1755_s25  }
  0x29   : > { %s250_s12 = sshll.u32 %s243_s27, 4  ;;  %2246 = sst [smem:[#allocation20_spill]] %s1892_s13  ;;  %s1889_s12 = int_to_ptr.vmem [resolvable:$true] %s250_s12 }
  0x2a   : > { %s1195_s6 = sadd.s32 4294967294, %s1755_s25   ;;  %p58_p13 = scmp.ne.s32.totalorder %s1731_s19, %s1727_s18 }
  0x2b   : > { %p2217_p1 = scmp.eq.s32.totalorder %s1892_s13, 0  ;;  %p84_p2 = scmp.ne.s32.totalorder %s1719_s16, %s1715_s15 }
  0x2c   : > { %p163_p8 = scmp.eq.s32.totalorder %s1195_s6, 3  ;;  %p1196_p10 = scmp.ge.s32.totalorder %s1755_s25, 1 }
  0x2d   : > { %p1903_p7 = por %p2217_p1, %p58_p13  ;;  %p1909_p9 = por %p84_p2, %p2217_p1 }
  0x2e   : > { %p1914_p11 = por %p163_p8, %p58_p13  ;;  %p170_p12 = scmp.lt.s32.totalorder %s1755_s25, 5 }
  0x2f   : > { %s2247_s30 = scalar_select %p1903_p7, 1, 0 }
  0x30   : > { %s2249_s8 = scalar_select %p1909_p9, 1, 0 }
  0x31   : > { %2248 = sst [smem:[#allocation21_spill]] %s2247_s30  ;;  %p1919_p5 = pnand %p1196_p10, %p170_p12 }
  0x32   : > { %2250 = sst [smem:[#allocation22_spill]] %s2249_s8  ;;  %s1760_s7 = smov [#allocation8]  }
  0x33   : > { %s2251_s10 = scalar_select %p1914_p11, 1, 0 }
  0x34   : > { %s182_s9 = sshll.u32 %s1760_s7, 4  ;;  %p1369_p3 = pneg %p1919_p5  ;;  %s183_s9 = int_to_ptr.vmem [resolvable:$true] %s182_s9 }
  0x35   : > { %2252 = sst [smem:[#allocation23_spill]] %s2251_s10  ;;  %s33_s6 = sadd.s32 1, %s1747_s23 }
  0x36   : > { %p1927_p2 = pnand %p1369_p3, %p2217_p1  ;;  %p1932_p13 = scmp.ge.s32.totalorder %s33_s6, 2 }
  0x37   : > { %p52_p8 = scmp.ne.s32.totalorder %s1735_s20, %s1731_s19  ;;  %s1556_s28 = scalar_lea.vmem %s183_s9, 1024 }
  0x38   : > { %p1547_p10 = pneg %p1927_p2  ;;  %p1557_p12 = scmp.ne.s32.totalorder %s183_s9, %s1556_s28 }
  0x39   : > { %p1564_p11 = scmp.lt.s32.totalorder %s183_s9, %s183_s9  ;;  %p1565_p9 = scmp.lt.s32.totalorder %s1556_s28, %s1556_s28 }
  0x3a   : > { %p1559_p6 = pnand %p1557_p12, %p1547_p10 }
  0x3b   : > { %p1566_p3 = por %p1565_p9, %p1564_p11 }
  0x3c   : > { %p1560_p0 = pneg %p1559_p6 }
  0x3e   : > { %p1567_p1 = pnand %p1566_p3, %p1560_p0 }
  0x40   : > { %1570 = shalt.err (!%p1567_p1)
}
  0x41   : > { %s2256_s7 = smov 4   ;;  %s2257_s1 = smov 64  }
  0x42   : > { %s2258_s3 = sld [smem:[#allocation28_spill]]  ;;  %s2300_s6 = smov (%p1932_p13, %s33_s6), 0 }
  0x43   : > { %2259 = sst [smem:[#allocation24_spill]] %s2300_s6  ;;  %s2260_s2 = sadd.s32 1, %s1751_s24 }
  0x44   : > { %s2302_s2 = smov (!%p1932_p13, %s2260_s2), %s1751_s24  ;;  %s41_s28 = ssub.s32 %s1747_s23, %s2300_s6 }
  0x45   : > { %p2261_p0 = scmp.eq.s32.totalorder %s1755_s25, 0  ;;  %p38_p6 = scmp.ge.s32.totalorder %s2302_s2, 2 }
  0x46   : > { %p2263_p9 = scmp.eq.s32.totalorder %s1892_s13, 3  ;;  %s2232_s27 = sand.u32 1, %s1735_s20  }
  0x47   : > { %p1965_p1 = por %p2261_p0, %p52_p8  ;;  %s1200_s26 = sshll.u32 %s1751_s24, 3 }
  0x48   : > { %1372 = dma.hbm_to_vmem [thread:$0]  (!%p1927_p2), %s2258_s3, 1024, %s183_s9, [#allocation9], %s2257_s1, %s2257_s1, %s2256_s7  }
  0x49   : > { %p1974_p11 = por %p2263_p9, %p52_p8  ;;  %s2304_s2 = smov (%p38_p6, %s2302_s2), 0 }
  0x4a   : > { %s1199_s5 = sshll.u32 %s2232_s27, 4  ;;  %s40_s3 = ssub.s32 %s1751_s24, %s2304_s2 }
  0x4b   : > { %s2264_s9 = scalar_select %p1974_p11, 1, 0 }
  0x4c   : > { %s42_s6 = sor.u32 %s41_s28, %s40_s3  ;;  %p69_p2 = scmp.eq.s32.totalorder %s40_s3, 0 }
  0x4d   : > { %2265 = sst [smem:[#allocation25_spill]] %s2264_s9  ;;  %p43_p13 = scmp.eq.s32.totalorder %s42_s6, 0 }
  0x4e   : > { %s205_s18 = sadd.s32 %s1747_s23, %s1200_s26  ;;  %s2266_s4 = sadd.s32 1, %s1723_s17 }
  0x4f   : > { %s1990_s21 = scalar_select %p69_p2, %s1723_s17, %s2266_s4  }
  0x50   : > { %s2267_s9 = sadd.s32 1, %s1735_s20  ;;  %s1201_s8 = sshll.u32 %s205_s18, 6 }
  0x51   : > { %s1995_s22 = scalar_select %p43_p13, %s1735_s20, %s2267_s9  }
  0x52   : > { %s200_s16 = scalar_lea.vmem [#allocation2], %s1199_s5  ;;  %s2000_s27 = scalar_lea.hbm %s2204_s0, %s1201_s8 }
  0x53   : > { %s208_s13 = sshll.u32 %s200_s16, 4  ;;  %p2268_p8 = scmp.lt.s32.totalorder %s1755_s25, 4  ;;  %s2002_s13 = int_to_ptr.vmem [resolvable:$true] %s208_s13 }
  0x54   : > { %s1584_s4 = scalar_lea.vmem %s1889_s12, 512  ;;  %p2270_p3 = pneg %p1866_p4 }
  0x55   : > { %p2008_p10 = pnand %p2268_p8, %p1965_p1  ;;  %p1585_p12 = scmp.ne.s32.totalorder %s1889_s12, %s1584_s4 }
  0x56   : > { %s1761_s16 = smov [#allocation7]  }
  0x57   : > { %p1587_p0 = pnand %p1585_p12, %p2270_p3  ;;  %s1589_s18 = sshll.u32 %s1761_s16, 4  ;;  %s1590_s18 = int_to_ptr.vmem [resolvable:$false] %s1589_s18 }
  0x58   : > { %s1591_s19 = scalar_lea.vmem %s1590_s18, 1024  ;;  %p1592_p9 = scmp.lt.s32.totalorder %s1889_s12, %s1590_s18 }
  0x59   : > { %p1588_p6 = pneg %p1587_p0  ;;  %p1593_p2 = scmp.lt.s32.totalorder %s1591_s19, %s1584_s4 }
  0x5b   : > { %p1594_p13 = por %p1593_p2, %p1592_p9 }
  0x5d   : > { %p1595_p11 = pnand %p1594_p13, %p1588_p6 }
  0x5f   : > { %1598 = shalt.err (!%p1595_p11)
}
  0x60   : > { %1382 = dma.hbm_to_vmem [thread:$0]  (!%p1866_p4), %s1873_s14, 512, %s1889_s12, %s1875_s29, %s2257_s1, %s2257_s1, %s2256_s7  }
  0x61   : > { %s2271_s5 = sand.u32 1, %s1735_s20   ;;  %p1601_p1 = pneg %p2008_p10 }
  0x62   : > { %s197_s30 = scalar_lea.sflag [#allocation3], %s2271_s5  ;;  %s1612_s8 = scalar_lea.vmem %s2002_s13, 256 }
  0x63   : > { %p1613_p11 = scmp.ne.s32.totalorder %s2002_s13, %s1612_s8  ;;  %s1762_s11 = smov [#allocation2]  }
  0x64   : > { %s1617_s6 = sshll.u32 %s1762_s11, 4  ;;  %s1618_s6 = int_to_ptr.vmem [resolvable:$false] %s1617_s6 }
  0x65   : > { %p1615_p8 = pnand %p1613_p11, %p1601_p1  ;;  %s1619_s28 = scalar_lea.vmem %s1618_s6, 512 }
  0x66   : > { %p1620_p3 = scmp.lt.s32.totalorder %s2002_s13, %s1618_s6  ;;  %p1621_p0 = scmp.lt.s32.totalorder %s1619_s28, %s1612_s8 }
  0x67   : > { %p1616_p12 = pneg %p1615_p8 }
  0x68   : > { %p1622_p6 = por %p1621_p0, %p1620_p3 }
  0x6a   : > { %p1623_p9 = pnand %p1622_p6, %p1616_p12 }
  0x6c   : > { %1626 = shalt.err (!%p1623_p9)
}
  0x6d   : > { %s1763_s10 = smov 128   ;;  %262 = sbr.rel (%p1919_p5) target bundleno = 915 (0x393), region = 36 }
  0x6e   : > { %1376 = dma.hbm_to_vmem [thread:$0]  (!%p2008_p10), %s2000_s27, 256, %s2002_s13, %s197_s30, %s1763_s10, %s2257_s1, %s2256_s7  }
  0x6f   : > { %s2272_s14 = sld [smem:[#allocation17_spill]] (!%p1919_p5) }
  0x75   : > { %s2042_s12 = sand.u32 1, %s2272_s14  }
  0x76   : > { %s1209_s9 = sshll.u32 %s2042_s12, 4  ;;  %s265_s26 = scalar_lea.sflag [#allocation3], %s2042_s12 }
  0x77   : > { %s2046_s4 = scalar_lea.vmem [#allocation2], %s1209_s9 }
  0x78   : > { %1698 = dma.done.wait (%p1903_p7), %s265_s26, 256  }
  0x79   : > { %1700 = vsyncadd (%p1903_p7), %s265_s26, 4294967040  ;;  %s2274_s3 = sld [smem:[#allocation20_spill]] }
  0x7a   : > { %s2275_s1 = sld [smem:[#allocation15_spill]] }
  0x7b   : > { %s2276_s13 = sld [smem:[#allocation22_spill]] }
  0x7f   : > { %s273_s15 = sand.u32 1, %s2274_s3  }
  0x80   : > { %s275_s7 = sand.u32 1, %s2275_s1   ;;  %s274_s16 = scalar_lea.sflag [#allocation6], %s273_s15 }
  0x81   : > { %s1210_s27 = sshll.u32 %s275_s7, 5  ;;  %p2277_p4 = scmp.ne.s32.totalorder %s2276_s13, 0 }
  0x82   : > { %s277_s18 = scalar_lea.vmem [#allocation5], %s1210_s27 }
  0x83   : > { %1702 = dma.done.wait (%p2277_p4), %s274_s16, 1024  }
  0x84   : > { %1704 = vsyncadd (%p2277_p4), %s274_s16, 4294966272  ;;  %s2058_s19 = scalar_lea.vmem [#allocation7], %s1210_s27  ;;  %p2278_p5 = scmp.eq.s32.totalorder %s2274_s3, 0 }
  0x86   : > { %1706 = dma.done.wait (%p2278_p5), [#allocation9], 1024   ;;  %p2279_p7 = pmov %p2278_p5 }
  0x87   : > { %v1764_v0 = vmov 0.0   ;;  %vm1765_vm0 = vmmov 0   ;;  %vm351_vm1 = vcmask 261120   ;;  %v1485_v1 = vld [vmem:[%s277_s18] sm:$0xff]   ;;  %v1486_v2 = vld [vmem:[%s277_s18 + $0x8] sm:$0xff]   ;;  %v1487_v4 = vld [vmem:[%s277_s18 + $0x10] sm:$0xff]  }
  0x88   : > { %1708 = vsyncadd (%p2279_p7), [#allocation9], 4294966272  ;;  %1277 = vmatprep.subr.bf16.mxu0 %v1764_v0  ;;  %1283 = vmatprep.subr.bf16.mxu1 %v1764_v0  ;;  %v356_v3 = vsel %vm351_vm1, %v1485_v1, 0  ;;  %v407_v5 = vsel %vm351_vm1, %v1486_v2, 0  ;;  %v1488_v6 = vld [vmem:[%s277_s18 + $0x18] sm:$0xff]   ;;  %v458_v8 = vsel %vm351_vm1, %v1487_v4, 0 }
  0x89   : > { %1279 = vmatprep.mubr.msk.bf16.mxu0 %vm1765_vm0, %v1764_v0  ;;  %1285 = vmatprep.mubr.msk.bf16.mxu1 %vm1765_vm0, %v1764_v0  ;;  %v326_v7 = vld [vmem:[%s2046_s4] sm:$0xf]  ;;  %v509_v9 = vsel %vm351_vm1, %v1488_v6, 0  ;;  %v327_v10 = vld [vmem:[%s2046_s4 + $0x4] sm:$0xf]  ;;  %vm551_vm2 = vcmask 130048  }
  0x8a   : > { %1278 = vmatpush3.bf16.xpose.msra.mxu0 %v356_v3  ;;  %1284 = vmatpush3.bf16.xpose.msra.mxu1 %v407_v5  ;;  %v328_v11 = vld [vmem:[%s2046_s4 + $0x8] sm:$0xf]  ;;  %v329_v12 = vld [vmem:[%s2046_s4 + $0xc] sm:$0xf]  ;;  %v1489_v33 = vld [vmem:[%s2058_s19] sm:$0xff]   ;;  %s2280_s5 = sld [smem:[#allocation19_spill]] }
  0x8b   : > { %1289 = vmatprep.subr.bf16.mxu0 %v1764_v0  ;;  %1295 = vmatprep.subr.bf16.mxu1 %v1764_v0  ;;  %v1490_v34 = vld [vmem:[%s2058_s19 + $0x8] sm:$0xff]   ;;  %v1491_v48 = vld [vmem:[%s2058_s19 + $0x10] sm:$0xff]   ;;  %v1492_v52 = vld [vmem:[%s2058_s19 + $0x18] sm:$0xff]   ;;  %s2281_s30 = sld [smem:[#allocation18_spill]]  ;;  %s1213_s8 = sshll.u32 %s2042_s12, 3 }
  0x8c   : > { %v1493_v61 = vld [vmem:[#allocation8 + $0x8] sm:$0xff]   ;;  %v1494_v62 = vld [vmem:[#allocation8] sm:$0xff]   ;;  %v1495_v63 = vld [vmem:[#allocation8 + $0x18] sm:$0xff]   ;;  %s2282_s10 = sld [smem:[#allocation25_spill]]  ;;  %s324_s14 = scalar_lea.vmem [#allocation10], %s1213_s8 }
  0x8d   : > { %v1496_v1 = vld [vmem:[#allocation8 + $0x10] sm:$0xff]   ;;  %s1056_s29 = sshll.u32 %s324_s14, 4  ;;  %s2283_s4 = sld [smem:[#allocation29_spill]]  ;;  %s2144_s29 = int_to_ptr.vmem [resolvable:$true] %s1056_s29 }
  0x8e   : > { %s1041_s1 = scalar_lea.sflag [#allocation4], %s2042_s12  ;;  %s1627_s13 = scalar_lea.vmem %s2144_s29, 128 }
  0x8f   : > { %p1628_p10 = scmp.ne.s32.totalorder %s2144_s29, %s1627_s13  ;;  %s1766_s15 = smov [#allocation10]  }
  0x90   : > { %s1243_s11 = sshll.u32 %s2280_s5, 1  ;;  %s1631_s7 = sshll.u32 %s1766_s15, 4  ;;  %s1632_s7 = int_to_ptr.vmem [resolvable:$false] %s1631_s7 }
  0x91   : > { %1280 = vmatmul.mubr.msk.bf16.vlgmr.msra.gmra.mxu0 %vm351_vm1, %v326_v7  ;;  %1286 = vmatmul.mubr.msk.bf16.vlgmr.msra.gmra.mxu1 %vm351_vm1, %v327_v10  ;;  %v1497_v10 = vld [vmem:[#allocation8 + $0x28] sm:$0xff]   ;;  %s1052_s6 = sadd.s32 %s2281_s30, %s1243_s11  ;;  %s1633_s27 = scalar_lea.vmem %s1632_s7, 256 }
  0x92   : > { %1290 = vmatpush3.bf16.xpose.msra.mxu0 %v458_v8  ;;  %1296 = vmatpush3.bf16.xpose.msra.mxu1 %v509_v9  ;;  %s1244_s28 = sshll.u32 %s1052_s6, 7  ;;  %p2284_p2 = scmp.ne.s32.totalorder %s2282_s10, 0 }
  0x93   : > { %1291 = vmatprep.mubr.msk.bf16.mxu0 %vm1765_vm0, %v1764_v0  ;;  %1297 = vmatprep.mubr.msk.bf16.mxu1 %vm1765_vm0, %v1764_v0  ;;  %s2142_s3 = scalar_lea.hbm %s2283_s4, %s1244_s28  ;;  %p1634_p11 = scmp.lt.s32.totalorder %s2144_s29, %s1632_s7 }
  0x94   : > { %1301 = vmatprep.subr.bf16.mxu0 %v1764_v0  ;;  %1307 = vmatprep.subr.bf16.mxu1 %v1764_v0  ;;  %p1629_p13 = pnand %p1628_p10, %p2284_p2  ;;  %p1635_p8 = scmp.lt.s32.totalorder %s1633_s27, %s1627_s13 }
  0x96   : > { %p1630_p1 = pneg %p1629_p13  ;;  %p1636_p12 = por %p1635_p8, %p1634_p11 }
  0x98   : > { %p1637_p3 = pnand %p1636_p12, %p1630_p1 }
  0x99   : > { %1292 = vmatmul.mubr.msk.bf16.vlgmr.msra.gmra.mxu0 %vm351_vm1, %v328_v11  ;;  %1298 = vmatmul.mubr.msk.bf16.vlgmr.msra.gmra.mxu1 %vm351_vm1, %v329_v12 }
  0x9a   : > { %1303 = vmatprep.mubr.msk.bf16.mxu0 %vm1765_vm0, %v1764_v0  ;;  %1309 = vmatprep.mubr.msk.bf16.mxu1 %vm1765_vm0, %v1764_v0 }
  0x9b   : > { %1302 = vmatpush3.bf16.msra.mxu0 %v1489_v33  ;;  %1308 = vmatpush3.bf16.msra.mxu1 %v1490_v34 }
  0x9c   : > { %1313 = vmatprep.subr.bf16.mxu0 %v1764_v0  ;;  %1319 = vmatprep.subr.bf16.mxu1 %v1764_v0 }
 0x151   : > { %v392_v13 = vpop.f32.mrf.mxu0  ;;  %v443_v14 = vpop.f32.mrf.mxu1 }
 0x152   : > { %v552_v15 = vsel %vm551_vm2, %v392_v13, -inf  ;;  %v555_v18 = vsel %vm551_vm2, %v443_v14, -inf }
 0x153   : > { %553 = vmax.xlane.f32.xlu0 %v552_v15  ;;  %v1281_v16 = vpop.f32.mrf.mxu0  ;;  %v1287_v17 = vpop.f32.mrf.mxu1 }
 0x155   : > { %v395_v19 = vpop.f32.mrf.mxu0  ;;  %v446_v20 = vpop.f32.mrf.mxu1 }
 0x156   : > { %v1499_v19 = vld [vmem:[#allocation8 + $0x38] sm:$0xff]  }
 0x157   : > { %556 = vmax.xlane.f32.xlu0 %v555_v18  ;;  %v1282_v21 = vpop.f32.mrf.mxu0  ;;  %v1288_v22 = vpop.f32.mrf.mxu1  ;;  %v1498_v18 = vld [vmem:[#allocation8 + $0x20] sm:$0xff]  }
 0x159   : > { %v494_v23 = vpop.f32.mrf.mxu0  ;;  %v545_v24 = vpop.f32.mrf.mxu1 }
 0x15a   : > { %v558_v25 = vsel %vm551_vm2, %v494_v23, -inf  ;;  %v561_v28 = vsel %vm551_vm2, %v545_v24, -inf }
 0x15b   : > { %559 = vmax.xlane.f32.xlu1 %v558_v25  ;;  %v1293_v26 = vpop.f32.mrf.mxu0  ;;  %v1299_v27 = vpop.f32.mrf.mxu1 }
 0x15c   : > { %v1500_v27 = vld [vmem:[#allocation8 + $0x30] sm:$0xff]  }
 0x15d   : > { %v497_v29 = vpop.f32.mrf.mxu0  ;;  %v548_v30 = vpop.f32.mrf.mxu1 }
 0x15f   : > { %562 = vmax.xlane.f32.xlu1 %v561_v28  ;;  %v1294_v31 = vpop.f32.mrf.mxu0  ;;  %v1300_v32 = vpop.f32.mrf.mxu1 }
 0x1dc   : > { %v554_v35 = vpop.xlane.xlu0 %553 }
 0x1dd   : > { %v564_v36 = vsub.f32 %v392_v13, %v554_v35 }
 0x1df   : > { %v568_v37 = vmul.f32 1.442695, %v564_v36 }
 0x1e0   : > { %v557_v38 = vpop.xlane.xlu0 %556 }
 0x1e1   : > { %1501 = vpow2.f32 %v568_v37  ;;  %v565_v39 = vsub.f32 %v443_v14, %v557_v38 }
 0x1e3   : > { %v570_v40 = vmul.f32 1.442695, %v565_v39 }
 0x1e4   : > { %v560_v41 = vpop.xlane.xlu1 %559 }
 0x1e5   : > { %1503 = vpow2.f32 %v570_v40  ;;  %v566_v42 = vsub.f32 %v494_v23, %v560_v41 }
 0x1e7   : > { %v572_v43 = vmul.f32 1.442695, %v566_v42 }
 0x1e8   : > { %v563_v44 = vpop.xlane.xlu1 %562 }
 0x1e9   : > { %1505 = vpow2.f32 %v572_v43  ;;  %v567_v45 = vsub.f32 %v545_v24, %v563_v44 }
 0x1eb   : > { %v574_v46 = vmul.f32 1.442695, %v567_v45 }
 0x1ed   : > { %1507 = vpow2.f32 %v574_v46 }
 0x1ee   : > { %v1502_v47 = vpop.eup %1501 }
 0x1ef   : > { %v576_v49 = vsel %vm551_vm2, %v1502_v47, 0.0  ;;  %v592_v50 = vpack.c.bf16 %v1502_v47, %v1502_v47 }
 0x1f0   : > { %577 = vadd.xlane.f32.xlu0 %v576_v49 }
 0x1f1   : > { %1304 = vmatmul.mubr.msk.bf16.vlgmr.msra.gmra.mxu0 %vm551_vm2, %v592_v50 }
 0x1f2   : > { %v1504_v51 = vpop.eup %1503  ;;  %1314 = vmatpush3.bf16.msra.mxu0 %v1491_v48  ;;  %1315 = vmatprep.mubr.msk.bf16.mxu0 %vm1765_vm0, %v1764_v0 }
 0x1f3   : > { %v579_v53 = vsel %vm551_vm2, %v1504_v51, 0.0  ;;  %v593_v54 = vpack.c.bf16 %v1504_v51, %v1504_v51  ;;  %1325 = vmatprep.subr.bf16.mxu0 %v1764_v0 }
 0x1f4   : > { %580 = vadd.xlane.f32.xlu1 %v579_v53 }
 0x1f5   : > { %1310 = vmatmul.mubr.msk.bf16.vlgmr.msra.gmra.mxu1 %vm551_vm2, %v593_v54 }
 0x1f6   : > { %v1506_v55 = vpop.eup %1505  ;;  %1320 = vmatpush3.bf16.msra.mxu1 %v1492_v52  ;;  %1321 = vmatprep.mubr.msk.bf16.mxu1 %vm1765_vm0, %v1764_v0 }
 0x1f7   : > { %v582_v56 = vsel %vm551_vm2, %v1506_v55, 0.0  ;;  %v594_v57 = vpack.c.bf16 %v1506_v55, %v1506_v55  ;;  %1333 = vmatprep.subr.bf16.mxu1 %v1764_v0 }
 0x1f8   : > { %583 = vadd.xlane.f32.xlu0 %v582_v56 }
 0x1f9   : > { %1316 = vmatmul.mubr.msk.bf16.vlgmr.msra.gmra.mxu0 %vm551_vm2, %v594_v57 }
 0x1fa   : > { %v1508_v58 = vpop.eup %1507  ;;  %1329 = vmatprep.mubr.msk.bf16.mxu0 %vm1765_vm0, %v1764_v0  ;;  %1326 = vmatpush3.bf16.msra.mxu0 %v1493_v61 }
 0x1fb   : > { %v585_v59 = vsel %vm551_vm2, %v1508_v58, 0.0  ;;  %v595_v60 = vpack.c.bf16 %v1508_v58, %v1508_v58  ;;  %1327 = vmatprep.subr.bf16.mxu0 %v1764_v0 }
 0x1fc   : > { %586 = vadd.xlane.f32.xlu1 %v585_v59 }
 0x1fd   : > { %1322 = vmatmul.mubr.msk.bf16.vlgmr.msra.gmra.mxu1 %vm551_vm2, %v595_v60 }
 0x1fe   : > { %1337 = vmatprep.mubr.msk.bf16.mxu1 %vm1765_vm0, %v1764_v0  ;;  %1328 = vmatpush3.bf16.msra.mxu0 %v1494_v62 }
 0x1ff   : > { %1334 = vmatpush3.bf16.msra.mxu1 %v1495_v63  ;;  %1341 = vmatprep.subr.bf16.mxu0 %v1764_v0 }
 0x200   : > { %1335 = vmatprep.subr.bf16.mxu1 %v1764_v0 }
 0x203   : > { %1336 = vmatpush3.bf16.msra.mxu1 %v1496_v1 }
 0x204   : > { %1349 = vmatprep.subr.bf16.mxu1 %v1764_v0 }
 0x279   : > { %v578_v2 = vpop.xlane.xlu0 %577 }
 0x27a   : > { %1509 = vrcp.f32 %v578_v2 }
 0x27d   : > { %v581_v3 = vpop.xlane.xlu1 %580 }
 0x27e   : > { %1511 = vrcp.f32 %v581_v3 }
 0x281   : > { %v584_v4 = vpop.xlane.xlu0 %583 }
 0x282   : > { %1513 = vrcp.f32 %v584_v4 }
 0x285   : > { %v587_v5 = vpop.xlane.xlu1 %586 }
 0x286   : > { %1515 = vrcp.f32 %v587_v5 }
 0x287   : > { %v1510_v6 = vpop.eup %1509 }
 0x28b   : > { %v1512_v12 = vpop.eup %1511 }
 0x28f   : > { %v1514_v21 = vpop.eup %1513 }
 0x293   : > { %v1516_v29 = vpop.eup %1515 }
 0x2b1   : > { %v639_v7 = vpop.f32.mrf.mxu0 }
 0x2b2   : > { %v792_v8 = vmul.f32 %v1510_v6, %v639_v7 }
 0x2b3   : > { %v1305_v9 = vpop.f32.mrf.mxu0 }
 0x2b4   : > { %v796_v11 = vpack.c.bf16 %v792_v8, %v792_v8 }
 0x2b5   : > { %v642_v13 = vpop.f32.mrf.mxu0  ;;  %v688_v14 = vpop.f32.mrf.mxu1 }
 0x2b6   : > { %v793_v15 = vmul.f32 %v1512_v12, %v688_v14  ;;  %1330 = vmatmul.mubr.msk.bf16.vlgmr.msra.gmra.mxu0 %vm351_vm1, %v796_v11 }
 0x2b7   : > { %v1306_v16 = vpop.f32.mrf.mxu0  ;;  %v1311_v17 = vpop.f32.mrf.mxu1  ;;  %1342 = vmatpush3.bf16.msra.mxu0 %v1497_v10  ;;  %1345 = vmatprep.mubr.msk.bf16.mxu0 %vm1765_vm0, %v1764_v0 }
 0x2b8   : > { %v797_v20 = vpack.c.bf16 %v793_v15, %v793_v15  ;;  %1343 = vmatprep.subr.bf16.mxu0 %v1764_v0 }
 0x2b9   : > { %v691_v22 = vpop.f32.mrf.mxu1  ;;  %v737_v23 = vpop.f32.mrf.mxu0 }
 0x2ba   : > { %v794_v24 = vmul.f32 %v1514_v21, %v737_v23  ;;  %1338 = vmatmul.mubr.msk.bf16.vlgmr.msra.gmra.mxu1 %vm351_vm1, %v797_v20 }
 0x2bb   : > { %v1312_v25 = vpop.f32.mrf.mxu1  ;;  %v1317_v26 = vpop.f32.mrf.mxu0  ;;  %1344 = vmatpush3.bf16.msra.mxu0 %v1498_v18  ;;  %1350 = vmatpush3.bf16.msra.mxu1 %v1499_v19 }
 0x2bc   : > { %v798_v28 = vpack.c.bf16 %v794_v24, %v794_v24  ;;  %1351 = vmatprep.subr.bf16.mxu1 %v1764_v0  ;;  %1353 = vmatprep.mubr.msk.bf16.mxu1 %vm1765_vm0, %v1764_v0 }
 0x2bd   : > { %v740_v30 = vpop.f32.mrf.mxu0  ;;  %v786_v31 = vpop.f32.mrf.mxu1 }
 0x2be   : > { %v795_v32 = vmul.f32 %v1516_v29, %v786_v31  ;;  %1346 = vmatmul.mubr.msk.bf16.vlgmr.msra.gmra.mxu0 %vm351_vm1, %v798_v28 }
 0x2bf   : > { %v1318_v33 = vpop.f32.mrf.mxu0  ;;  %v1323_v34 = vpop.f32.mrf.mxu1  ;;  %1352 = vmatpush3.bf16.msra.mxu1 %v1500_v27 }
 0x2c0   : > { %v799_v35 = vpack.c.bf16 %v795_v32, %v795_v32 }
 0x2c1   : > { %v789_v36 = vpop.f32.mrf.mxu1 }
 0x2c2   : > { %1354 = vmatmul.mubr.msk.bf16.vlgmr.msra.gmra.mxu1 %vm351_vm1, %v799_v35 }
 0x2c3   : > { %v1324_v37 = vpop.f32.mrf.mxu1 }
 0x376   : > { %v865_v38 = vpop.f32.mrf.mxu0 }
 0x378   : > { %v1331_v39 = vpop.f32.mrf.mxu0 }
 0x37a   : > { %v868_v0 = vpop.f32.mrf.mxu0  ;;  %v920_v40 = vpop.f32.mrf.mxu1 }
 0x37b   : > { %v1036_v45 = vadd.f32 %v920_v40, %v865_v38 }
 0x37c   : > { %v1332_v41 = vpop.f32.mrf.mxu0  ;;  %v1339_v42 = vpop.f32.mrf.mxu1 }
 0x37e   : > { %v923_v43 = vpop.f32.mrf.mxu1  ;;  %v975_v44 = vpop.f32.mrf.mxu0 }
 0x37f   : > { %v1037_v48 = vadd.f32 %v1036_v45, %v975_v44 }
 0x380   : > { %v1340_v46 = vpop.f32.mrf.mxu1  ;;  %v1347_v47 = vpop.f32.mrf.mxu0 }
 0x382   : > { %v978_v49 = vpop.f32.mrf.mxu0  ;;  %v1030_v50 = vpop.f32.mrf.mxu1 }
 0x383   : > { %v1038_v51 = vadd.f32 %v1037_v48, %v1030_v50 }
 0x384   : > { %v1348_v52 = vpop.f32.mrf.mxu0  ;;  %v1355_v53 = vpop.f32.mrf.mxu1 }
 0x385   : > { %1039 = vst [vmem:[%s324_s14] sm:$0xff] %v1038_v51 }
 0x386   : > { %v1033_v54 = vpop.f32.mrf.mxu1 }
 0x387   : > { %1640 = shalt.err (!%p1637_p3)
}
 0x388   : > { %s1641_s16 = scalar_lea.hbm %s2142_s3, 128  ;;  %s1645_s19 = scalar_lea.hbm %s2283_s4, 512 }
 0x389   : > { %p1642_p0 = scmp.ne.s32.totalorder %s2142_s3, %s1641_s16  ;;  %p1646_p4 = scmp.lt.s32.totalorder %s2142_s3, %s2283_s4 }
 0x38a   : > { %p1647_p5 = scmp.lt.s32.totalorder %s1645_s19, %s1641_s16 }
 0x38b   : > { %p1643_p6 = pnand %p1642_p0, %p2284_p2 }
 0x38c   : > { %p1648_p7 = por %p1647_p5, %p1646_p4 }
 0x38d   : > { %p1644_p9 = pneg %p1643_p6 }
 0x38f   : > { %p1649_p10 = pnand %p1648_p7, %p1644_p9 }
 0x391   : > { %1652 = shalt.err (!%p1649_p10)
}
 0x392   : > { %1367 = dma.vmem_to_hbm [thread:$0]  (%p2284_p2), %s2144_s29, 128, %s2142_s3, %s1041_s1   ;;  %v1356_v55 = vpop.f32.mrf.mxu1 }
 0x393 PF: > { %s2285_s8 = sld [smem:[#allocation16_spill]]  ;;  %p1390_p13 = scmp.ge.s32.totalorder %s1755_s25, 2 }
 0x394   : > { %s2286_s11 = sld [smem:[#allocation23_spill]] }
 0x399   : > { %s1068_s6 = sand.u32 1, %s2285_s8  }
 0x39a   : > { %p2287_p1 = scmp.ne.s32.totalorder %s2286_s11, 0  ;;  %s1069_s28 = scalar_lea.sflag [#allocation4], %s1068_s6 }
 0x39c   : > { %p1384_p11 = pnand %p1390_p13, %p2287_p1 }
 0x39e   : > { %p1385_p8 = pneg %p1384_p11 }
 0x3a0   : > { %1710 = dma.done.wait (%p1385_p8), %s1069_s28, 128  }
 0x3a1   : > { %1712 = vsyncadd (%p1385_p8), %s1069_s28, 4294967168  ;;  %s24_s25 = sadd.s32 1, %s1755_s25   ;;  %s2288_s15 = sld [smem:[#allocation15_spill]] }
 0x3a2   : > { %p21_p12 = scmp.ge.s32.totalorder %s24_s25, 6   ;;  %s2289_s18 = sld [smem:[#allocation17_spill]] }
 0x3a3   : > { %s2290_s10 = sld [smem:[#allocation24_spill]]  ;;  %s2291_s16 = smov %s1723_s17 }
 0x3a4   : > { %s2292_s17 = smov %s1990_s21  ;;  %s2293_s19 = smov %s1735_s20 }
 0x3a5   : > { %s2294_s20 = smov %s1995_s22  ;;  %s2295_s21 = smov %s1747_s23 }
 0x3a6   : > { %s2296_s22 = smov %s1751_s24  ;;  %s2298_s24 = smov %s2304_s2 }
 0x3a7   :  { %23 = sbr.rel (!%p21_p12) target bundleno = 17 (0x11), region = 109 }
 0x3a9   : > { %s2297_s23 = smov %s2290_s10 }
 0x3ac   :  { %1074 = vsyncpa [#allocation3], 1 }
 0x3ad   :  { %1076 = vsyncpa [#allocation3 + $0x1], 1 }
 0x3ae   :  { %1077 = vsyncpa [#allocation6], 1 }
 0x3af   :  { %1079 = vsyncpa [#allocation6 + $0x1], 1 }
 0x3b0   :  { %1080 = vsyncpa [#allocation9], 1 }
 0x3b1   :  { %1081 = vsyncpa [#allocation4], 1 }
 0x3b2   :  { %1083 = vsyncpa [#allocation4 + $0x1], 1 }

</bundles_post_ra>
